<compile_context>
chip_gen: v5e
topology: v5e:2x2
jax: 0.10.0
libtpu: 0.0.40
codegen_flags: <defaults>
</compile_context>

<pallas_src>
import functools

import jax
import jax.numpy as jnp
from jax import lax
from jax.experimental import pallas as pl
from jax.experimental.pallas import tpu as pltpu

_LANE = 128
_SUB = 8


def _round_up(v, m):
    return ((v + m - 1) // m) * m


def _lrn_kernel(x_ref, o_ref, *, size, alpha, beta, k):
    """Block: (1, C, TS, 128). Channels are the LRN window axis."""
    C = x_ref.shape[1]
    prePad = (size - 1) // 2 + 1
    prePadCrop = C if prePad > C else prePad
    a_s = jnp.float32(alpha / size)
    kk = jnp.float32(k)

    def load(c):
        return x_ref[0, c].astype(jnp.float32)          # (TS, 128)

    def sq(c):
        v = load(c)
        return v * v

    if abs(beta - 0.75) < 1e-12:
        def inv_pow(s):                                  # s ** -0.75 via rsqrt/sqrt
            r = lax.rsqrt(s)
            return r * jnp.sqrt(r)
    else:
        def inv_pow(s):                                  # generic s ** -beta
            return jnp.exp(jnp.float32(-beta) * jnp.log(s))

    def emit(c, scale_run):
        s = scale_run * a_s + kk
        o_ref[0, c] = (inv_pow(s) * load(c)).astype(o_ref.dtype)

    # Channel 0: sum of squares over the first prePadCrop channels.
    scale_run = sq(0)
    for c in range(1, prePadCrop):
        scale_run = scale_run + sq(c)
    emit(0, scale_run)

    if C <= 32:
        # Small channel count: statically unrolled rolling-window recurrence
        # (faithful to the quirky PyTorch bounds conditions).
        for c in range(1, C):
            if c < C - prePad + 1:
                scale_run = scale_run + sq(c + prePad - 1)
            if c > prePad:
                scale_run = scale_run - sq(c - prePad)
            emit(c, scale_run)
    else:
        # Large channel count: lightly-unrolled fori_loop with dynamic channel
        # indexing; boundary conditions handled with scalar where-masks.
        def body(c, carry):
            add_ok = (c + prePad - 1) <= (C - 1)
            av = load(jnp.minimum(c + prePad - 1, C - 1))
            carry = carry + jnp.where(add_ok, av * av, jnp.float32(0.0))
            sub_ok = c > prePad
            sv = load(jnp.maximum(c - prePad, 0))
            carry = carry - jnp.where(sub_ok, sv * sv, jnp.float32(0.0))
            emit(c, carry)
            return carry

        lax.fori_loop(1, C, body, scale_run, unroll=4)


def spatial_cross_map_lrn(x, size, alpha=0.0001, beta=0.75, k=1.0):
    """Forward of SpatialCrossMapLRN_tmp. x: (N, C, H, W)."""
    N, C, H, W = x.shape
    HW = H * W
    itemsize = jnp.dtype(x.dtype).itemsize

    # Spatial rows of 128 lanes; row count padded to a multiple of 8 sublanes.
    S0 = -(-HW // _LANE)
    s_pad8 = _round_up(S0, _SUB)

    # Pick a spatial tile TS (sublane rows) so double-buffered in+out blocks
    # (4 * C * TS * 128 * itemsize) stay within ~40 MiB (headroom under v7x's
    # 64 MiB physical VMEM).
    budget = 40 * 1024 * 1024
    ts_max = budget // (4 * C * _LANE * itemsize)
    ts_max = max(_SUB, (ts_max // _SUB) * _SUB)

    if s_pad8 <= ts_max:
        TS = s_pad8
    else:
        # Choose the tile (multiple of 8, <= ts_max) that minimizes padding.
        best_ts, best_pad = _SUB, _round_up(S0, _SUB)
        cand = ts_max
        while cand >= _SUB:
            padded = _round_up(S0, cand)
            if padded < best_pad or (padded == best_pad and cand > best_ts):
                best_ts, best_pad = cand, padded
            cand -= _SUB
        TS = best_ts
    S = _round_up(S0, TS)
    HWp = S * _LANE

    xr = x.reshape(N, C, HW)
    if HWp != HW:
        xr = jnp.pad(xr, ((0, 0), (0, 0), (0, HWp - HW)))
    xr = xr.reshape(N, C, S, _LANE)

    kernel = functools.partial(
        _lrn_kernel, size=int(size), alpha=float(alpha), beta=float(beta),
        k=float(k))

    out = pl.pallas_call(
        kernel,
        out_shape=jax.ShapeDtypeStruct((N, C, S, _LANE), x.dtype),
        grid=(N, S // TS),
        in_specs=[pl.BlockSpec((1, C, TS, _LANE), lambda n, s: (n, 0, s, 0))],
        out_specs=pl.BlockSpec((1, C, TS, _LANE), lambda n, s: (n, 0, s, 0)),
        compiler_params=pltpu.CompilerParams(
            dimension_semantics=("parallel", "parallel"),
            vmem_limit_bytes=48 * 1024 * 1024,
        ),
        cost_estimate=pl.CostEstimate(
            flops=8 * N * C * HWp,
            transcendentals=2 * N * C * HWp,
            bytes_accessed=2 * N * C * HWp * itemsize,
        ),
    )(xr)

    # Slice off spatial padding (padded lanes never touch real outputs).
    return out.reshape(N, C, HWp)[:, :, :HW].reshape(N, C, H, W)


def _reference_lrn(x, size, alpha=0.0001, beta=0.75, k=1.0):
    """Plain-JAX reference reproducing the PyTorch loop exactly."""
    N, C, H, W = x.shape
    sq = x * x
    prePad = int((size - 1) / 2 + 1)
    prePadCrop = C if prePad > C else prePad
    scale_first = jnp.zeros_like(sq[:, 0])
    for c in range(prePadCrop):
        scale_first = scale_first + sq[:, c]
    scales = [scale_first]
    for c in range(1, C):
        cur = scales[c - 1]
        if c < C - prePad + 1:
            cur = cur + sq[:, c + prePad - 1]
        if c > prePad:
            cur = cur - sq[:, c - prePad]
        scales.append(cur)
    scale = jnp.stack(scales, axis=1) * (alpha / size) + k
    return (scale ** (-beta)) * x


# TODO(synk): backward (updateGradInput) is not implemented; only the forward
# pass of the module is translated.

if __name__ == "__main__":
    key = jax.random.PRNGKey(0)
    N, C, H, W = 2, 4, 16, 16
    x = jax.random.normal(key, (N, C, H, W), dtype=jnp.float32)

    size = 5  # LRN window (module __init__ arg)
    out = spatial_cross_map_lrn(x, size=size, alpha=0.0001, beta=0.75, k=1.0)
    out = jax.block_until_ready(out)

    ref = _reference_lrn(x, size=size, alpha=0.0001, beta=0.75, k=1.0)
    assert out.shape == (N, C, H, W)
    assert jnp.allclose(out, ref, atol=1e-5, rtol=1e-5)

    print("KERNEL_OK")
</pallas_src>

<mosaic_0001>
module attributes {stable_mosaic.version = 11 : i64} {
  func.func @_lrn_kernel(%arg0: i32, %arg1: i32, %arg2: memref<1x4x8x128xf32, #tpu.memory_space<vmem>>, %arg3: memref<1x4x8x128xf32, #tpu.memory_space<vmem>>) attributes {dimension_semantics = [#tpu.dimension_semantics<parallel>, #tpu.dimension_semantics<parallel>], iteration_bounds = array<i64: 2, 1>, scalar_prefetch = 0 : i64, scratch_operands = 0 : i64, tpu.core_type = #tpu.core_type<tc>, window_params = [{transform_indices = @transform_0, window_bounds = array<i64: 1, 4, 8, 128>}, {transform_indices = @transform_1, window_bounds = array<i64: 1, 4, 8, 128>}]} {
    %c0 = arith.constant 0 : index
    %c0_0 = arith.constant 0 : index
    %c0_1 = arith.constant 0 : index
    %c0_2 = arith.constant 0 : index
    %0 = vector.load %arg2[%c0, %c0_0, %c0_1, %c0_2] : memref<1x4x8x128xf32, #tpu.memory_space<vmem>>, vector<1x1x8x128xf32>
    %1 = vector.shape_cast %0 : vector<1x1x8x128xf32> to vector<8x128xf32>
    %2 = arith.mulf %1, %1 : vector<8x128xf32>
    %c0_3 = arith.constant 0 : index
    %c1 = arith.constant 1 : index
    %c0_4 = arith.constant 0 : index
    %c0_5 = arith.constant 0 : index
    %3 = vector.load %arg2[%c0_3, %c1, %c0_4, %c0_5] : memref<1x4x8x128xf32, #tpu.memory_space<vmem>>, vector<1x1x8x128xf32>
    %4 = vector.shape_cast %3 : vector<1x1x8x128xf32> to vector<8x128xf32>
    %5 = arith.mulf %4, %4 : vector<8x128xf32>
    %6 = arith.addf %2, %5 : vector<8x128xf32>
    %c0_6 = arith.constant 0 : index
    %c2 = arith.constant 2 : index
    %c0_7 = arith.constant 0 : index
    %c0_8 = arith.constant 0 : index
    %7 = vector.load %arg2[%c0_6, %c2, %c0_7, %c0_8] : memref<1x4x8x128xf32, #tpu.memory_space<vmem>>, vector<1x1x8x128xf32>
    %8 = vector.shape_cast %7 : vector<1x1x8x128xf32> to vector<8x128xf32>
    %9 = arith.mulf %8, %8 : vector<8x128xf32>
    %10 = arith.addf %6, %9 : vector<8x128xf32>
    %cst = arith.constant 2.000000e-05 : f32
    %11 = vector.broadcast %cst : f32 to vector<8x128xf32>
    %12 = arith.mulf %10, %11 : vector<8x128xf32>
    %cst_9 = arith.constant 1.000000e+00 : f32
    %13 = vector.broadcast %cst_9 : f32 to vector<8x128xf32>
    %14 = arith.addf %12, %13 : vector<8x128xf32>
    %15 = math.rsqrt %14 : vector<8x128xf32>
    %16 = math.sqrt %15 : vector<8x128xf32>
    %17 = arith.mulf %15, %16 : vector<8x128xf32>
    %c0_10 = arith.constant 0 : index
    %c0_11 = arith.constant 0 : index
    %c0_12 = arith.constant 0 : index
    %c0_13 = arith.constant 0 : index
    %18 = vector.load %arg2[%c0_10, %c0_11, %c0_12, %c0_13] : memref<1x4x8x128xf32, #tpu.memory_space<vmem>>, vector<1x1x8x128xf32>
    %19 = vector.shape_cast %18 : vector<1x1x8x128xf32> to vector<8x128xf32>
    %20 = arith.mulf %17, %19 : vector<8x128xf32>
    %c0_14 = arith.constant 0 : index
    %c0_15 = arith.constant 0 : index
    %c0_16 = arith.constant 0 : index
    %c0_17 = arith.constant 0 : index
    %21 = vector.load %arg3[%c0_14, %c0_15, %c0_16, %c0_17] : memref<1x4x8x128xf32, #tpu.memory_space<vmem>>, vector<1x1x8x128xf32>
    %22 = vector.shape_cast %21 : vector<1x1x8x128xf32> to vector<8x128xf32>
    %23 = vector.shape_cast %20 : vector<8x128xf32> to vector<1x1x8x128xf32>
    tpu.vector_store %arg3[%c0_14, %c0_15, %c0_16, %c0_17], %23 {strides = array<i32>} : memref<1x4x8x128xf32, #tpu.memory_space<vmem>>, vector<1x1x8x128xf32>,
    %c0_18 = arith.constant 0 : index
    %c3 = arith.constant 3 : index
    %c0_19 = arith.constant 0 : index
    %c0_20 = arith.constant 0 : index
    %24 = vector.load %arg2[%c0_18, %c3, %c0_19, %c0_20] : memref<1x4x8x128xf32, #tpu.memory_space<vmem>>, vector<1x1x8x128xf32>
    %25 = vector.shape_cast %24 : vector<1x1x8x128xf32> to vector<8x128xf32>
    %26 = arith.mulf %25, %25 : vector<8x128xf32>
    %27 = arith.addf %10, %26 : vector<8x128xf32>
    %cst_21 = arith.constant 2.000000e-05 : f32
    %28 = vector.broadcast %cst_21 : f32 to vector<8x128xf32>
    %29 = arith.mulf %27, %28 : vector<8x128xf32>
    %cst_22 = arith.constant 1.000000e+00 : f32
    %30 = vector.broadcast %cst_22 : f32 to vector<8x128xf32>
    %31 = arith.addf %29, %30 : vector<8x128xf32>
    %32 = math.rsqrt %31 : vector<8x128xf32>
    %33 = math.sqrt %32 : vector<8x128xf32>
    %34 = arith.mulf %32, %33 : vector<8x128xf32>
    %c0_23 = arith.constant 0 : index
    %c1_24 = arith.constant 1 : index
    %c0_25 = arith.constant 0 : index
    %c0_26 = arith.constant 0 : index
    %35 = vector.load %arg2[%c0_23, %c1_24, %c0_25, %c0_26] : memref<1x4x8x128xf32, #tpu.memory_space<vmem>>, vector<1x1x8x128xf32>
    %36 = vector.shape_cast %35 : vector<1x1x8x128xf32> to vector<8x128xf32>
    %37 = arith.mulf %34, %36 : vector<8x128xf32>
    %c0_27 = arith.constant 0 : index
    %c1_28 = arith.constant 1 : index
    %c0_29 = arith.constant 0 : index
    %c0_30 = arith.constant 0 : index
    %38 = vector.load %arg3[%c0_27, %c1_28, %c0_29, %c0_30] : memref<1x4x8x128xf32, #tpu.memory_space<vmem>>, vector<1x1x8x128xf32>
    %39 = vector.shape_cast %38 : vector<1x1x8x128xf32> to vector<8x128xf32>
    %40 = vector.shape_cast %37 : vector<8x128xf32> to vector<1x1x8x128xf32>
    tpu.vector_store %arg3[%c0_27, %c1_28, %c0_29, %c0_30], %40 {strides = array<i32>} : memref<1x4x8x128xf32, #tpu.memory_space<vmem>>, vector<1x1x8x128xf32>,
    %cst_31 = arith.constant 2.000000e-05 : f32
    %41 = vector.broadcast %cst_31 : f32 to vector<8x128xf32>
    %42 = arith.mulf %27, %41 : vector<8x128xf32>
    %cst_32 = arith.constant 1.000000e+00 : f32
    %43 = vector.broadcast %cst_32 : f32 to vector<8x128xf32>
    %44 = arith.addf %42, %43 : vector<8x128xf32>
    %45 = math.rsqrt %44 : vector<8x128xf32>
    %46 = math.sqrt %45 : vector<8x128xf32>
    %47 = arith.mulf %45, %46 : vector<8x128xf32>
    %c0_33 = arith.constant 0 : index
    %c2_34 = arith.constant 2 : index
    %c0_35 = arith.constant 0 : index
    %c0_36 = arith.constant 0 : index
    %48 = vector.load %arg2[%c0_33, %c2_34, %c0_35, %c0_36] : memref<1x4x8x128xf32, #tpu.memory_space<vmem>>, vector<1x1x8x128xf32>
    %49 = vector.shape_cast %48 : vector<1x1x8x128xf32> to vector<8x128xf32>
    %50 = arith.mulf %47, %49 : vector<8x128xf32>
    %c0_37 = arith.constant 0 : index
    %c2_38 = arith.constant 2 : index
    %c0_39 = arith.constant 0 : index
    %c0_40 = arith.constant 0 : index
    %51 = vector.load %arg3[%c0_37, %c2_38, %c0_39, %c0_40] : memref<1x4x8x128xf32, #tpu.memory_space<vmem>>, vector<1x1x8x128xf32>
    %52 = vector.shape_cast %51 : vector<1x1x8x128xf32> to vector<8x128xf32>
    %53 = vector.shape_cast %50 : vector<8x128xf32> to vector<1x1x8x128xf32>
    tpu.vector_store %arg3[%c0_37, %c2_38, %c0_39, %c0_40], %53 {strides = array<i32>} : memref<1x4x8x128xf32, #tpu.memory_space<vmem>>, vector<1x1x8x128xf32>,
    %cst_41 = arith.constant 2.000000e-05 : f32
    %54 = vector.broadcast %cst_41 : f32 to vector<8x128xf32>
    %55 = arith.mulf %27, %54 : vector<8x128xf32>
    %cst_42 = arith.constant 1.000000e+00 : f32
    %56 = vector.broadcast %cst_42 : f32 to vector<8x128xf32>
    %57 = arith.addf %55, %56 : vector<8x128xf32>
    %58 = math.rsqrt %57 : vector<8x128xf32>
    %59 = math.sqrt %58 : vector<8x128xf32>
    %60 = arith.mulf %58, %59 : vector<8x128xf32>
    %c0_43 = arith.constant 0 : index
    %c3_44 = arith.constant 3 : index
    %c0_45 = arith.constant 0 : index
    %c0_46 = arith.constant 0 : index
    %61 = vector.load %arg2[%c0_43, %c3_44, %c0_45, %c0_46] : memref<1x4x8x128xf32, #tpu.memory_space<vmem>>, vector<1x1x8x128xf32>
    %62 = vector.shape_cast %61 : vector<1x1x8x128xf32> to vector<8x128xf32>
    %63 = arith.mulf %60, %62 : vector<8x128xf32>
    %c0_47 = arith.constant 0 : index
    %c3_48 = arith.constant 3 : index
    %c0_49 = arith.constant 0 : index
    %c0_50 = arith.constant 0 : index
    %64 = vector.load %arg3[%c0_47, %c3_48, %c0_49, %c0_50] : memref<1x4x8x128xf32, #tpu.memory_space<vmem>>, vector<1x1x8x128xf32>
    %65 = vector.shape_cast %64 : vector<1x1x8x128xf32> to vector<8x128xf32>
    %66 = vector.shape_cast %63 : vector<8x128xf32> to vector<1x1x8x128xf32>
    tpu.vector_store %arg3[%c0_47, %c3_48, %c0_49, %c0_50], %66 {strides = array<i32>} : memref<1x4x8x128xf32, #tpu.memory_space<vmem>>, vector<1x1x8x128xf32>,
    return
  }
  func.func @transform_0(%arg0: i32, %arg1: i32) -> (i32, i32, i32, i32) {
    %c0_i32 = arith.constant 0 : i32
    %c0_i32_0 = arith.constant 0 : i32
    %c0_i32_1 = arith.constant 0 : i32
    return %arg0, %c0_i32, %arg1, %c0_i32_0 : i32, i32, i32, i32
  }
  func.func @transform_1(%arg0: i32, %arg1: i32) -> (i32, i32, i32, i32) {
    %c0_i32 = arith.constant 0 : i32
    %c0_i32_0 = arith.constant 0 : i32
    %c0_i32_1 = arith.constant 0 : i32
    return %arg0, %c0_i32, %arg1, %c0_i32_0 : i32, i32, i32, i32
  }
}

</mosaic_0001>

<bundles_post_ra>
// kernel: tpu_custom_call.1
= control target key start
LH: loop header
LB: loop body
LE: loop exit
PB: predicated region body
PF: predicated region fallthrough
CT: control target
= control target key end

     0   :  { %6 = vsyncpa [#allocation3], 0  ;;  %s706_s0 = inlined_call_operand.hbm [shape: f32[2,4,8,128], index: 0, kind: input, shape index: {}]   ;;  %s707_s1 = inlined_call_operand.hbm [shape: f32[2,4,8,128], index: 1, kind: output, shape index: {}]  }
   0x1   :  { %8 = vsyncpa [#allocation3 + $0x1], 0 }
   0x2   :  { %9 = vsyncpa [#allocation4], 0 }
   0x3   :  { %11 = vsyncpa [#allocation4 + $0x1], 0  ;;  %s562_s6 = smov 0   ;;  %s564_s7 = smov 0  }
   0x4   :  { %s566_s8 = smov 0   ;;  %s568_s9 = smov 0  }
   0x5   :  { %s570_s10 = smov 0   ;;  %s572_s11 = smov 0  }
   0x6 LB: > { %s334_s12 = sadd.s32 4294967295, %s546_s11   ;;  %s335_s13 = sadd.s32 4294967294, %s546_s11   ;;  %s546_s11 = sphi %s572_s11, %s17_s11   ;;  %s542_s10 = sphi %s570_s10, %s716_s10   ;;  %s538_s9 = sphi %s568_s9, %s715_s9   ;;  %s534_s8 = sphi %s566_s8, %s714_s8   ;;  %s530_s7 = sphi %s564_s7, %s713_s7   ;;  %s526_s6 = sphi %s562_s6, %s712_s6  }
   0x7   : > { %s29_s14 = sadd.s32 1, %s542_s10  ;;  %s38_s15 = sadd.s32 1, %s534_s8 }
   0x8   : > { %p31_p0 = scmp.ge.s32.totalorder %s29_s14, 2  ;;  %p45_p1 = scmp.ne.s32.totalorder %s534_s8, %s530_s7 }
   0x9   : > { %p46_p2 = scmp.eq.s32.totalorder %s546_s11, 0  ;;  %p51_p3 = scmp.ne.s32.totalorder %s530_s7, %s526_s6 }
   0xa   : > { %s718_s14 = smov (%p31_p0, %s29_s14), 0  ;;  %p52_p5 = scmp.eq.s32.totalorder %s334_s12, 0 }
   0xb   : > { %p603_p4 = por %p46_p2, %p45_p1  ;;  %s33_s17 = ssub.s32 %s542_s10, %s718_s14 }
   0xc   : > { %p77_p6 = scmp.eq.s32.totalorder %s334_s12, 1  ;;  %p36_p7 = scmp.eq.s32.totalorder %s33_s17, 0 }
   0xd   : > { %p609_p8 = por %p52_p5, %p51_p3  ;;  %p83_p10 = scmp.eq.s32.totalorder %s335_s13, 1 }
   0xe   : > { %p613_p9 = por %p77_p6, %p45_p1  ;;  %p337_p12 = scmp.ge.s32.totalorder %s546_s11, 2 }
   0xf   : > { %s618_s20 = scalar_select %p36_p7, %s534_s8, %s38_s15  }
  0x10   : > { %p620_p11 = por %p83_p10, %p51_p3  ;;  %p372_p13 = scmp.lt.s32.totalorder %s546_s11, 2 }
  0x11   : > { %s103_s22 = sand.u32 1, %s534_s8   ;;  %s358_s24 = sshll.u32 %s542_s10, 5 }
  0x12   : > { %s338_s23 = sshll.u32 %s103_s22, 5  ;;  %s113_s27 = scalar_lea.hbm %s706_s0, %s358_s24 }
  0x13   : > { %s107_s28 = scalar_lea.vmem [#allocation2], %s338_s23  ;;  %s114_s30 = sshll.u32 %s113_s27, 4  ;;  %s115_s30 = int_to_ptr.hbm [resolvable:$true] %s114_s30 }
  0x14   : > { %s116_s29 = sshll.u32 %s107_s28, 4  ;;  %p365_p0 = pnand %p372_p13, %p603_p4  ;;  %s117_s29 = int_to_ptr.vmem [resolvable:$true] %s116_s29 }
  0x15   : > { %p341_p1 = scmp.ge.s32.totalorder %s546_s11, 1  ;;  %s104_s2 = scalar_lea.sflag [#allocation3], %s103_s22 }
  0x16   : > { %s548_s3 = smov 128   ;;  %s549_s4 = smov 8  }
  0x17   : > { %367 = dma.hbm_to_vmem [thread:$0]  (!%p365_p0), %s115_s30, 512, %s117_s29, %s104_s2, %s548_s3, %s548_s3, %s549_s4  }
  0x18   : > { %p124_p2 = scmp.lt.s32.totalorder %s546_s11, 3 }
  0x1a   : > { %p125_p3 = pnand %p341_p1, %p124_p2 }
  0x1b   : > { %s636_s5 = sand.u32 (!%p125_p3), 1, %s530_s7  }
  0x1c   : > { %128 = sbr.rel (%p125_p3) target bundleno = 96 (0x60), region = 24  ;;  %s342_s12 = sshll.u32 (!%p125_p3), %s636_s5, 5 }
  0x1d   : > { %s131_s13 = scalar_lea.sflag (!%p125_p3), [#allocation3], %s636_s5  ;;  %s134_s15 = scalar_lea.vmem (!%p125_p3), [#allocation2], %s342_s12 }
  0x21   : > { %517 = dma.done.wait (%p609_p8), %s131_s13, 512  }
  0x22   : > { %519 = vsyncadd (%p609_p8), %s131_s13, 4294966784  ;;  %v646_v0 = vld [vmem:[%s134_s15] sm:$0xff]  ;;  %v648_v1 = vld [vmem:[%s134_s15 + $0x8] sm:$0xff]  ;;  %s359_s16 = sshll.u32 %s538_s9, 5  ;;  %s153_s23 = scalar_lea.vmem [#allocation5], %s342_s12 }
  0x23   : > { %v650_v2 = vld [vmem:[%s134_s15 + $0x10] sm:$0xff]  ;;  %v155_v3 = vmul.f32 %v646_v0, %v646_v0  ;;  %v158_v4 = vmul.f32 %v648_v1, %v648_v1  ;;  %v658_v6 = vld [vmem:[%s134_s15 + $0x18] sm:$0xff]  ;;  %s245_s22 = scalar_lea.hbm %s707_s1, %s359_s16  ;;  %s246_s24 = sshll.u32 %s153_s23, 4  ;;  %s247_s24 = int_to_ptr.vmem [resolvable:$true] %s246_s24 }
  0x24   : > { %v162_v5 = vmul.f32 %v650_v2, %v650_v2  ;;  %v193_v8 = vmul.f32 %v658_v6, %v658_v6  ;;  %s248_s9 = sshll.u32 %s245_s22, 4  ;;  %s233_s25 = scalar_lea.sflag [#allocation4], %s636_s5  ;;  %s249_s9 = int_to_ptr.hbm [resolvable:$true] %s248_s9 }
  0x25   : > { %v159_v7 = vadd.f32 %v158_v4, %v155_v3  ;;  %s478_s26 = sshra.s32 %s249_s9, 4  ;;  %s484_s30 = scalar_lea.hbm %s707_s1, 64  ;;  %s479_s26 = int_to_ptr.hbm [resolvable:$true] %s478_s26 }
  0x26   : > { %s480_s27 = scalar_lea.hbm %s479_s26, 32  ;;  %p485_p7 = scmp.lt.s32.totalorder %s479_s26, %s707_s1 }
  0x27   : > { %v163_v9 = vadd.f32 %v162_v5, %v159_v7  ;;  %p481_p4 = scmp.ne.s32.totalorder %s479_s26, %s480_s27  ;;  %p486_p8 = scmp.lt.s32.totalorder %s484_s30, %s480_s27 }
  0x29   : > { %v164_v10 = vmul.f32 2e-05, %v163_v9  ;;  %v194_v11 = vadd.f32 %v193_v8, %v163_v9  ;;  %p482_p5 = pnand %p481_p4, %p613_p9  ;;  %p487_p10 = por %p486_p8, %p485_p7 }
  0x2b   : > { %v165_v12 = vadd.f32 1.0, %v164_v10  ;;  %v195_v13 = vmul.f32 2e-05, %v194_v11  ;;  %p483_p6 = pneg %p482_p5 }
  0x2d   : > { %426 = vrsqrt.f32 %v165_v12  ;;  %v196_v14 = vadd.f32 1.0, %v195_v13  ;;  %vm172_vm0 = vweird.f32 %v165_v12  ;;  %p488_p13 = pnand %p487_p10, %p483_p6 }
  0x2f   : > { %428 = vrsqrt.f32 %v196_v14  ;;  %vm203_vm2 = vweird.f32 %v196_v14 }
  0x33   : > { %v427_v15 = vpop.eup %426 }
  0x34   : > { %v167_v16 = vmul.f32 %v427_v15, %v165_v12  ;;  %vm173_vm1 = vweird.f32 %v427_v15 }
  0x35   : > { %v429_v17 = vpop.eup %428  ;;  %vm174_vm4 = vmor %vm172_vm0, %vm173_vm1 }
  0x36   : > { %v168_v18 = vmul.f32 %v427_v15, %v167_v16  ;;  %v198_v19 = vmul.f32 %v429_v17, %v196_v14  ;;  %vm204_vm3 = vweird.f32 %v429_v17 }
  0x37   : > { %vm205_vm5 = vmor %vm203_vm2, %vm204_vm3 }
  0x38   : > { %v169_v20 = vmul.f32 0.5, %v168_v18  ;;  %v199_v21 = vmul.f32 %v429_v17, %v198_v19 }
  0x3a   : > { %v170_v22 = vsub.f32 1.5, %v169_v20  ;;  %v200_v23 = vmul.f32 0.5, %v199_v21 }
  0x3c   : > { %v171_v24 = vmul.f32 %v427_v15, %v170_v22  ;;  %v201_v25 = vsub.f32 1.5, %v200_v23 }
  0x3e   : > { %v175_v26 = vsel %vm174_vm4, %v427_v15, %v171_v24  ;;  %v202_v27 = vmul.f32 %v429_v17, %v201_v25 }
  0x3f   : > { %430 = vrsqrt.f32 %v175_v26  ;;  %vm183_vm6 = vcmp.eq.f32.partialorder %v175_v26, inf  ;;  %v186_v40 = vand.u32 2147483648, %v175_v26  ;;  %vm185_vm7 = vcmp.eq.f32.partialorder %v175_v26, 0.0 }
  0x40   : > { %v206_v28 = vsel %vm205_vm5, %v429_v17, %v202_v27 }
  0x41   : > { %432 = vrsqrt.f32 %v206_v28  ;;  %vm214_vm8 = vcmp.eq.f32.partialorder %v206_v28, inf  ;;  %v217_v43 = vand.u32 2147483648, %v206_v28  ;;  %vm216_vm9 = vcmp.eq.f32.partialorder %v206_v28, 0.0 }
  0x45   : > { %v431_v29 = vpop.eup %430 }
  0x46   : > { %v177_v30 = vmul.f32 %v431_v29, %v175_v26 }
  0x47   : > { %v433_v31 = vpop.eup %432 }
  0x48   : > { %v178_v32 = vmul.f32 %v431_v29, %v177_v30  ;;  %v208_v33 = vmul.f32 %v433_v31, %v206_v28 }
  0x4a   : > { %v179_v34 = vmul.f32 0.5, %v178_v32  ;;  %v209_v35 = vmul.f32 %v433_v31, %v208_v33 }
  0x4c   : > { %v180_v36 = vsub.f32 1.5, %v179_v34  ;;  %v210_v37 = vmul.f32 0.5, %v209_v35 }
  0x4e   : > { %v181_v38 = vmul.f32 %v431_v29, %v180_v36  ;;  %v211_v39 = vsub.f32 1.5, %v210_v37 }
  0x50   : > { %v182_v41 = vmul.f32 %v181_v38, %v175_v26  ;;  %v212_v42 = vmul.f32 %v433_v31, %v211_v39 }
  0x52   : > { %v184_v44 = vsel %vm183_vm6, %v175_v26, %v182_v41  ;;  %v213_v45 = vmul.f32 %v212_v42, %v206_v28 }
  0x53   : > { %v187_v46 = vsel %vm185_vm7, %v186_v40, %v184_v44 }
  0x54   : > { %v188_v47 = vmul.f32 %v187_v46, %v175_v26  ;;  %v215_v48 = vsel %vm214_vm8, %v206_v28, %v213_v45 }
  0x55   : > { %v218_v49 = vsel %vm216_vm9, %v217_v43, %v215_v48 }
  0x56   : > { %v189_v50 = vmul.f32 %v188_v47, %v646_v0  ;;  %v219_v51 = vmul.f32 %v218_v49, %v206_v28 }
  0x58   : > { %190 = vst [vmem:[%s153_s23] sm:$0xff] %v189_v50  ;;  %v221_v52 = vmul.f32 %v648_v1, %v219_v51  ;;  %v225_v53 = vmul.f32 %v650_v2, %v219_v51  ;;  %v229_v54 = vmul.f32 %v658_v6, %v219_v51 }
  0x5a   : > { %348 = vst [vmem:[%s153_s23 + $0x8] sm:$0xff] %v221_v52 }
  0x5b   : > { %350 = vst [vmem:[%s153_s23 + $0x10] sm:$0xff] %v225_v53 }
  0x5c   : > { %352 = vst [vmem:[%s153_s23 + $0x18] sm:$0xff] %v229_v54 }
  0x5d   : > { %491 = shalt.err (!%p488_p13)
}
  0x5e   : > { %s550_s4 = smov 128   ;;  %s551_s5 = smov 8  }
  0x5f   : > { %362 = dma.vmem_to_hbm [thread:$0]  (%p613_p9), %s247_s24, 512, %s249_s9, %s233_s25, %s550_s4, %s550_s4, %s551_s5  }
  0x60 PF: > { %s263_s12 = sand.u32 1, %s526_s6   ;;  %p369_p0 = pnand %p337_p12, %p620_p11 }
  0x61   : > { %s264_s13 = scalar_lea.sflag [#allocation4], %s263_s12 }
  0x62   : > { %p370_p1 = pneg %p369_p0 }
  0x64   : > { %521 = dma.done.wait (%p370_p1), %s264_s13, 512  }
  0x65   : > { %523 = vsyncadd (%p370_p1), %s264_s13, 4294966784  ;;  %s17_s11 = sadd.s32 1, %s546_s11   ;;  %s712_s6 = smov %s530_s7 }
  0x66   : > { %p14_p2 = scmp.ge.s32.totalorder %s17_s11, 4   ;;  %s713_s7 = smov %s534_s8 }
  0x67   : > { %s714_s8 = smov %s618_s20  ;;  %s715_s9 = smov %s542_s10 }
  0x68   : > { %s716_s10 = smov %s718_s14  ;;  %16 = sbr.rel (!%p14_p2) target bundleno = 6 (0x6), region = 75 }
  0x6d   :  { %270 = vsyncpa [#allocation3], 1 }
  0x6e   :  { %272 = vsyncpa [#allocation3 + $0x1], 1 }
  0x6f   :  { %273 = vsyncpa [#allocation4], 1 }
  0x70   :  { %275 = vsyncpa [#allocation4 + $0x1], 1 }

</bundles_post_ra>
